<compile_context>
chip_gen: v5e
topology: v5e:2x2
jax: 0.10.0
libtpu: 0.0.40
codegen_flags: <defaults>
</compile_context>

<pallas_src>
import functools

import numpy as np
import jax
import jax.numpy as jnp
from jax.experimental import pallas as pl
from jax.experimental.pallas import tpu as pltpu

EPS = 1e-5
_LANE = 128
_ACC_BYTES = 128 * 1024              # soft cap for the f32 (co_tile, tile_m) block
_RHS_SCRATCH_CAP = 16 * 1024 * 1024  # cap for the stacked-RHS VMEM scratch (fused)
_SINGLE_BUF_MIN_BYTES = 1 * 1024 * 1024


def _round_up(x, m):
    return -(-x // m) * m


# ---------------------------------------------------------------------------
# Chip budget / feature probes
# ---------------------------------------------------------------------------
@functools.lru_cache(maxsize=None)
def _chip_budget():
    """(max M-tile lanes, per-kernel VMEM limit) derived from the actual chip."""
    vmem_cap = 128 * 1024 * 1024
    try:
        vmem_cap = int(pltpu.get_tpu_info().vmem_capacity_bytes)
    except Exception:
        pass
    if vmem_cap <= 64 * 1024 * 1024:          # v7x-class core (64 MiB VMEM)
        return 512, 40 * 1024 * 1024
    return 1024, 64 * 1024 * 1024             # v5e / v6e (128 MiB VMEM)


_BUFFERED1_OK = None


def _probe_buffered1():
    """One-time probe: is pipeline_mode=pl.Buffered(1) usable on this install?"""
    global _BUFFERED1_OK
    if _BUFFERED1_OK is not None:
        return _BUFFERED1_OK
    try:
        def _k(x_ref, o_ref):
            o_ref[...] = x_ref[...] + 1.0

        fn = pl.pallas_call(
            _k,
            grid=(2,),
            in_specs=[pl.BlockSpec((8, 128), lambda i: (0, 0),
                                   pipeline_mode=pl.Buffered(1))],
            out_specs=pl.BlockSpec((8, 128), lambda i: (0, 0)),
            out_shape=jax.ShapeDtypeStruct((8, 128), jnp.float32))
        r = jax.block_until_ready(fn(jnp.zeros((8, 128), jnp.float32)))
        _BUFFERED1_OK = bool(jnp.all(r == 1.0))
    except Exception:
        _BUFFERED1_OK = False
    return _BUFFERED1_OK


def _resident_spec(shape, index_map, nbytes):
    """BlockSpec for a block whose index_map is constant across the inner grid
    axes; single-buffer it (halves VMEM) when large and supported."""
    if nbytes >= _SINGLE_BUF_MIN_BYTES and _BUFFERED1_OK:
        try:
            return pl.BlockSpec(shape, index_map, pipeline_mode=pl.Buffered(1))
        except Exception:
            pass
    return pl.BlockSpec(shape, index_map)


# ---------------------------------------------------------------------------
# Pallas kernels
# ---------------------------------------------------------------------------
def _stack_taps(x_ref, rhs_ref, base, tap_offsets, cin_pad, tile_m):
    """Copy the T shifted (cin_pad, tile_m) windows into the stacked RHS so the
    whole conv becomes ONE (co_tile, T*cin_pad) @ (T*cin_pad, tile_m) matmul."""
    for t, off in enumerate(tap_offsets):
        rhs_ref[t * cin_pad:(t + 1) * cin_pad, :] = (
            x_ref[0, :, pl.ds(base + off, tile_m)])


def _conv_fused_kernel(*refs, tap_offsets, cin_pad, tile_m, apply_in,
                       norm_groups, inv_count, activation, has_skip):
    """Single-call conv + bias (+ InstanceNorm) + activation (+ skip)."""
    if apply_in:
        if has_skip:
            x_ref, w_ref, b_ref, mask_ref, skip_ref, y_ref, rhs_ref = refs
        else:
            x_ref, w_ref, b_ref, mask_ref, y_ref, rhs_ref = refs
            skip_ref = None
    else:
        if has_skip:
            x_ref, w_ref, b_ref, skip_ref, y_ref, rhs_ref = refs
        else:
            x_ref, w_ref, b_ref, y_ref, rhs_ref = refs
            skip_ref = None
        mask_ref = None

    _stack_taps(x_ref, rhs_ref, 0, tap_offsets, cin_pad, tile_m)
    y = jnp.dot(w_ref[...], rhs_ref[...],
                preferred_element_type=jnp.float32) + b_ref[...]

    if apply_in:
        mask = mask_ref[...]                                  # (1, tile_m) f32
        ym = y * mask
        yy = ym * y
        if norm_groups > 1:
            # Sub-pixel decoder: sum the stats over the `norm_groups` parity
            # copies of each base channel (channel = co*groups + parity).
            co = y.shape[0]
            gi = jax.lax.broadcasted_iota(jnp.int32, (co, co), 0) // norm_groups
            gj = jax.lax.broadcasted_iota(jnp.int32, (co, co), 1) // norm_groups
            gmat = (gi == gj).astype(jnp.float32)
            ym = jnp.dot(gmat, ym, preferred_element_type=jnp.float32)
            yy = jnp.dot(gmat, yy, preferred_element_type=jnp.float32)
        s1 = jnp.sum(ym, axis=1, keepdims=True)               # (co_tile, 1)
        s2 = jnp.sum(yy, axis=1, keepdims=True)
        mean = s1 * inv_count
        var = jnp.maximum(s2 * inv_count - mean * mean, 0.0)
        y = (y - mean) * jax.lax.rsqrt(var + EPS)

    if activation == "relu":
        y = jnp.maximum(y, 0.0)
    elif activation == "tanh":
        y = jnp.tanh(y)
    if skip_ref is not None:
        y = y + skip_ref[0].astype(jnp.float32)
    y_ref[0] = y.astype(y_ref.dtype)


def _conv_act_kernel(x_ref, w_ref, b_ref, y_ref, rhs_ref, *,
                     tap_offsets, cin_pad, tile_m, activation):
    """Two-pass path, no InstanceNorm: conv + bias + activation."""
    base = pl.multiple_of(pl.program_id(2) * tile_m, _LANE)
    _stack_taps(x_ref, rhs_ref, base, tap_offsets, cin_pad, tile_m)
    y = jnp.dot(w_ref[...], rhs_ref[...],
                preferred_element_type=jnp.float32) + b_ref[...]
    if activation == "relu":
        y = jnp.maximum(y, 0.0)
    elif activation == "tanh":
        y = jnp.tanh(y)
    y_ref[0] = y.astype(y_ref.dtype)


def _conv_stats_kernel(x_ref, w_ref, b_ref, mask_ref, y_ref, s1_ref, s2_ref,
                       rhs_ref, *, tap_offsets, cin_pad, tile_m):
    """Two-pass path: conv + bias, accumulating masked per-channel sum / sumsq
    across the (innermost, 'arbitrary') M grid axis."""
    m = pl.program_id(2)
    base = pl.multiple_of(m * tile_m, _LANE)
    _stack_taps(x_ref, rhs_ref, base, tap_offsets, cin_pad, tile_m)
    y = jnp.dot(w_ref[...], rhs_ref[...],
                preferred_element_type=jnp.float32) + b_ref[...]

    mask = mask_ref[...]
    ym = y * mask
    s1 = jnp.sum(ym, axis=1, keepdims=True)
    s2 = jnp.sum(ym * y, axis=1, keepdims=True)

    @pl.when(m == 0)
    def _():
        s1_ref[...] = jnp.zeros_like(s1_ref)
        s2_ref[...] = jnp.zeros_like(s2_ref)

    s1_ref[0] = s1_ref[0] + s1
    s2_ref[0] = s2_ref[0] + s2
    y_ref[0] = y.astype(y_ref.dtype)


def _in_apply_kernel(*refs, inv_count, activation, has_skip):
    """Two-pass path: InstanceNorm apply (+activation, +skip); output aliased
    onto the raw conv output."""
    if has_skip:
        y_ref, s1_ref, s2_ref, skip_ref, o_ref = refs
    else:
        y_ref, s1_ref, s2_ref, o_ref = refs
        skip_ref = None
    y = y_ref[0].astype(jnp.float32)
    mean = s1_ref[0] * inv_count
    var = jnp.maximum(s2_ref[0] * inv_count - mean * mean, 0.0)
    z = (y - mean) * jax.lax.rsqrt(var + EPS)
    if activation == "relu":
        z = jnp.maximum(z, 0.0)
    elif activation == "tanh":
        z = jnp.tanh(z)
    if skip_ref is not None:
        z = z + skip_ref[0].astype(jnp.float32)
    o_ref[0] = z.astype(o_ref.dtype)


# ---------------------------------------------------------------------------
# Generic fused conv layer wrapper
# ---------------------------------------------------------------------------
def _choose_co_tile(cw_pad, tile_m, batch):
    co = cw_pad
    # keep the f32 result block within a sane number of vregs
    while co > 8 and co * tile_m * 4 > _ACC_BYTES:
        co //= 2
    # give megacore a second parallel axis when there is no batch parallelism
    if batch == 1 and co == cw_pad and cw_pad >= 16:
        co = cw_pad // 2
    co = max(8, (co // 8) * 8)
    while cw_pad % co:
        co -= 8
    return co


def _conv_layer(xp, w_taps, bias, tap_offsets, Ho, Wo, Wp, *, apply_in,
                activation="none", skip=None, norm_groups=1,
                io_dtype=jnp.bfloat16, max_tile=None, fuse_limit=None):
    """Stride-1 multi-tap conv on padded NCHW input `xp` (N, Cin, Hp, Wp).

    w_taps: (T, Cw, Cin); returns (N, Cw, Ho, Wo) in io_dtype.  apply_in=True
    adds InstanceNorm (stats over the whole image, grouped over `norm_groups`
    parity copies per base channel); `activation` in {"none","relu","tanh"};
    `skip` (N, Cw, Ho, Wo) is added last."""
    N, Cin, Hp, Wp_in = xp.shape
    assert Wp_in == Wp
    T, Cw, Cin_w = w_taps.shape
    assert Cin_w == Cin and Cw % norm_groups == 0

    chip_tile, vmem_limit = _chip_budget()
    if max_tile is None:
        max_tile = chip_tile
    if fuse_limit is None:
        fuse_limit = 4 * max_tile

    itemsize = jnp.dtype(io_dtype).itemsize
    cin_pad = _round_up(Cin, 8)
    cw_pad = _round_up(Cw, 8)          # pad amount is a multiple of norm_groups
    k_stack = T * cin_pad

    M_wide = Ho * Wp
    m_pad128 = _round_up(M_wide, _LANE)
    max_off = max(tap_offsets)

    fused = (m_pad128 <= fuse_limit and
             k_stack * m_pad128 * itemsize <= _RHS_SCRATCH_CAP)
    if fused:
        tile_m, n_m, M_pad = m_pad128, 1, m_pad128
    else:
        tile_m = max((max_tile // _LANE) * _LANE, _LANE)
        n_m = -(-m_pad128 // tile_m)
        M_pad = n_m * tile_m

    L = _round_up(max(Hp * Wp, M_pad + max_off), _LANE)

    # flat, channel- and length-padded activation (zero pads multiply zero
    # weight rows / are masked out of the statistics)
    x_flat = xp.reshape(N, Cin, Hp * Wp)
    x_flat = jnp.pad(x_flat, ((0, 0), (0, cin_pad - Cin),
                              (0, L - Hp * Wp))).astype(io_dtype)

    # stacked weights: (Cw_pad, T*Cin_pad), contraction ordered (tap, cin)
    w = jnp.pad(w_taps, ((0, 0), (0, cw_pad - Cw), (0, cin_pad - Cin)))
    w_stack = jnp.transpose(w, (1, 0, 2)).reshape(cw_pad, k_stack).astype(io_dtype)
    b2 = jnp.pad(bias, (0, cw_pad - Cw)).reshape(cw_pad, 1).astype(jnp.float32)

    co_tile = _choose_co_tile(cw_pad, tile_m, N)
    n_co = cw_pad // co_tile
    inv_count = 1.0 / float(norm_groups * Ho * Wo)

    # valid-column mask (flat-offset junk columns + M padding), compile-time
    mask_arr = None
    if apply_in:
        col = np.arange(M_pad)
        valid = ((col % Wp) < Wo) & (col < M_wide)
        mask_arr = jnp.asarray(valid.astype(np.float32)).reshape(1, M_pad)

    skip_w = None
    if skip is not None:
        skip_w = jnp.pad(skip, ((0, 0), (0, cw_pad - Cw), (0, 0), (0, Wp - Wo)))
        skip_w = skip_w.reshape(N, cw_pad, M_wide)
        skip_w = jnp.pad(skip_w, ((0, 0), (0, 0),
                                  (0, M_pad - M_wide))).astype(io_dtype)

    x_bytes = cin_pad * L * itemsize

    if fused:
        x_spec = _resident_spec((1, cin_pad, L), lambda n, co: (n, 0, 0), x_bytes)
        w_spec = pl.BlockSpec((co_tile, k_stack), lambda n, co: (co, 0))
        b_spec = pl.BlockSpec((co_tile, 1), lambda n, co: (co, 0))
        y_spec = pl.BlockSpec((1, co_tile, M_pad), lambda n, co: (n, co, 0))
        mask_spec = pl.BlockSpec((1, M_pad), lambda n, co: (0, 0))

        in_specs = [x_spec, w_spec, b_spec]
        args = [x_flat, w_stack, b2]
        if apply_in:
            in_specs.append(mask_spec)
            args.append(mask_arr)
        if skip_w is not None:
            in_specs.append(y_spec)
            args.append(skip_w)

        kernel = functools.partial(
            _conv_fused_kernel, tap_offsets=tuple(tap_offsets),
            cin_pad=cin_pad, tile_m=M_pad, apply_in=apply_in,
            norm_groups=norm_groups, inv_count=inv_count,
            activation=activation, has_skip=skip_w is not None)
        y_out = pl.pallas_call(
            kernel,
            grid=(N, n_co),
            in_specs=in_specs,
            out_specs=y_spec,
            out_shape=jax.ShapeDtypeStruct((N, cw_pad, M_pad), io_dtype),
            scratch_shapes=[pltpu.VMEM((k_stack, M_pad), io_dtype)],
            compiler_params=pltpu.CompilerParams(
                dimension_semantics=("parallel", "parallel"),
                vmem_limit_bytes=vmem_limit),
        )(*args)
    else:
        x_spec = _resident_spec((1, cin_pad, L), lambda n, co, m: (n, 0, 0),
                                x_bytes)
        w_spec = pl.BlockSpec((co_tile, k_stack), lambda n, co, m: (co, 0))
        b_spec = pl.BlockSpec((co_tile, 1), lambda n, co, m: (co, 0))
        y_spec = pl.BlockSpec((1, co_tile, tile_m), lambda n, co, m: (n, co, m))
        s_spec = pl.BlockSpec((1, co_tile, 1), lambda n, co, m: (n, co, 0))
        mask_spec = pl.BlockSpec((1, tile_m), lambda n, co, m: (0, m))
        scratch = [pltpu.VMEM((k_stack, tile_m), io_dtype)]

        if not apply_in:
            kernel = functools.partial(
                _conv_act_kernel, tap_offsets=tuple(tap_offsets),
                cin_pad=cin_pad, tile_m=tile_m, activation=activation)
            y_out = pl.pallas_call(
                kernel,
                grid=(N, n_co, n_m),
                in_specs=[x_spec, w_spec, b_spec],
                out_specs=y_spec,
                out_shape=jax.ShapeDtypeStruct((N, cw_pad, M_pad), io_dtype),
                scratch_shapes=scratch,
                compiler_params=pltpu.CompilerParams(
                    dimension_semantics=("parallel", "parallel", "parallel"),
                    vmem_limit_bytes=vmem_limit),
            )(x_flat, w_stack, b2)
        else:
            kernel = functools.partial(
                _conv_stats_kernel, tap_offsets=tuple(tap_offsets),
                cin_pad=cin_pad, tile_m=tile_m)
            y_raw, s1, s2 = pl.pallas_call(
                kernel,
                grid=(N, n_co, n_m),
                in_specs=[x_spec, w_spec, b_spec, mask_spec],
                out_specs=[y_spec, s_spec, s_spec],
                out_shape=[jax.ShapeDtypeStruct((N, cw_pad, M_pad), io_dtype),
                           jax.ShapeDtypeStruct((N, cw_pad, 1), jnp.float32),
                           jax.ShapeDtypeStruct((N, cw_pad, 1), jnp.float32)],
                scratch_shapes=scratch,
                compiler_params=pltpu.CompilerParams(
                    dimension_semantics=("parallel", "parallel", "arbitrary"),
                    vmem_limit_bytes=vmem_limit),
            )(x_flat, w_stack, b2, mask_arr)

            if norm_groups > 1:
                g = norm_groups
                s1 = s1.reshape(N, cw_pad // g, g, 1).sum(axis=2, keepdims=True)
                s1 = jnp.broadcast_to(s1, (N, cw_pad // g, g, 1)).reshape(
                    N, cw_pad, 1)
                s2 = s2.reshape(N, cw_pad // g, g, 1).sum(axis=2, keepdims=True)
                s2 = jnp.broadcast_to(s2, (N, cw_pad // g, g, 1)).reshape(
                    N, cw_pad, 1)

            in_specs = [y_spec, s_spec, s_spec]
            args = [y_raw, s1, s2]
            if skip_w is not None:
                in_specs.append(y_spec)
                args.append(skip_w)
            apply_kernel = functools.partial(
                _in_apply_kernel, inv_count=inv_count,
                activation=activation, has_skip=skip_w is not None)
            y_out = pl.pallas_call(
                apply_kernel,
                grid=(N, n_co, n_m),
                in_specs=in_specs,
                out_specs=y_spec,
                out_shape=jax.ShapeDtypeStruct((N, cw_pad, M_pad), io_dtype),
                input_output_aliases={0: 0},     # y_raw is dead after the apply
                compiler_params=pltpu.CompilerParams(
                    dimension_semantics=("parallel", "parallel", "parallel"),
                    vmem_limit_bytes=vmem_limit),
            )(*args)

    y_out = y_out[:, :Cw, :M_wide].reshape(N, Cw, Ho, Wp)[:, :, :, :Wo]
    return y_out


# ---------------------------------------------------------------------------
# Layer wrappers (plain-JAX glue: padding / parity rearrangements / weights)
# ---------------------------------------------------------------------------
def conv_reflect_s1(x, w, b, *, pad, apply_in, activation="none", skip=None,
                    **kw):
    """Stride-1 reflect-padded Conv2d. x: (N,C,H,W); w: (Cout,Cin,K,K)."""
    N, C, H, W = x.shape
    Cout, Cin, K, _ = w.shape
    xp = jnp.pad(x, ((0, 0), (0, 0), (pad, pad), (pad, pad)), mode="reflect")
    Hp, Wp = H + 2 * pad, W + 2 * pad
    Ho, Wo = Hp - K + 1, Wp - K + 1
    w_taps = jnp.transpose(w, (2, 3, 0, 1)).reshape(K * K, Cout, Cin)
    offs = [kh * Wp + kw_ for kh in range(K) for kw_ in range(K)]
    return _conv_layer(xp, w_taps, b, offs, Ho, Wo, Wp, apply_in=apply_in,
                       activation=activation, skip=skip, norm_groups=1, **kw)


def _encoder_eff_weights(w):
    """3x3/stride-2 conv -> equivalent 2x2/stride-1 conv on space-to-depth input."""
    Cout, Cin, K, _ = w.shape
    taps = []
    for dy in (0, 1):
        for dx in (0, 1):
            blocks = []
            for py in (0, 1):
                for px in (0, 1):
                    ky, kx = 2 * dy + py, 2 * dx + px
                    if ky < K and kx < K:
                        blocks.append(w[:, :, ky, kx])
                    else:
                        blocks.append(jnp.zeros((Cout, Cin), w.dtype))
            taps.append(jnp.concatenate(blocks, axis=1))     # (Cout, 4*Cin)
    return jnp.stack(taps, axis=0)                            # (4, Cout, 4*Cin)


def conv_encoder_s2(x, w, b, **kw):
    """EncoderBlock: reflect-pad Conv2d(k3,s2) + InstanceNorm + ReLU, lowered to
    a stride-1 2x2 conv on the space-to-depth input (even H/W assumed)."""
    xp = jnp.pad(x, ((0, 0), (0, 0), (1, 1), (1, 1)), mode="reflect")
    subs = [xp[:, :, py::2, px::2] for py in (0, 1) for px in (0, 1)]
    xs = jnp.concatenate(subs, axis=1)                        # (N, 4C, Hs, Ws)
    Hs, Ws = xs.shape[2], xs.shape[3]
    Ho, Wo = Hs - 1, Ws - 1
    w_eff = _encoder_eff_weights(w)
    offs = [dy * Ws + dx for dy in (0, 1) for dx in (0, 1)]
    return _conv_layer(xs, w_eff, b, offs, Ho, Wo, Ws, apply_in=True,
                       activation="relu", norm_groups=1, **kw)


def _decoder_eff_weights(w):
    """ConvTranspose(k3,s2,p1,op1) -> 2x2 conv producing Cout*4 parity channels,
    channel index = co*4 + (py*2+px)."""
    Cin, Cout, K, _ = w.shape
    taps = []
    for dy in (0, 1):
        for dx in (0, 1):
            parts = []
            for py in (0, 1):
                for px in (0, 1):
                    ky, kx = py + 1 - 2 * dy, px + 1 - 2 * dx
                    if 0 <= ky < K and 0 <= kx < K:
                        parts.append(jnp.transpose(w[:, :, ky, kx]))  # (Cout,Cin)
                    else:
                        parts.append(jnp.zeros((Cout, Cin), w.dtype))
            tap = jnp.stack(parts, axis=1).reshape(Cout * 4, Cin)
            taps.append(tap)
    return jnp.stack(taps, axis=0)                             # (4, 4*Cout, Cin)


def conv_transpose_decoder(x, w, b, **kw):
    """DecoderBlock: ConvTranspose2d(k3,s2,p1,op1) + InstanceNorm + ReLU via
    sub-pixel decomposition + pixel shuffle (no zero-dilated input)."""
    N, _, H, W = x.shape
    Cout = w.shape[1]
    xp = jnp.pad(x, ((0, 0), (0, 0), (0, 1), (0, 1)))          # zero pad b/r
    Ws = W + 1
    w_eff = _decoder_eff_weights(w)
    b_eff = jnp.repeat(b, 4)
    offs = [dy * Ws + dx for dy in (0, 1) for dx in (0, 1)]
    y = _conv_layer(xp, w_eff, b_eff, offs, H, W, Ws, apply_in=True,
                    activation="relu", norm_groups=4, **kw)
    # depth-to-space: channel index = co*4 + (py*2 + px)
    y = y.reshape(N, Cout, 2, 2, H, W)
    y = jnp.transpose(y, (0, 1, 4, 2, 5, 3))
    return y.reshape(N, Cout, 2 * H, 2 * W)


# ---------------------------------------------------------------------------
# Parameters (deterministic, PyTorch-like uniform fan-in bound)
# ---------------------------------------------------------------------------
def _init_conv(key, cout, cin, k):
    kw_, kb_ = jax.random.split(key)
    bound = 1.0 / (cin * k * k) ** 0.5
    w = jax.random.uniform(kw_, (cout, cin, k, k), jnp.float32, -bound, bound)
    b = jax.random.uniform(kb_, (cout,), jnp.float32, -bound, bound)
    return w, b


def _init_convT(key, cin, cout, k):
    kw_, kb_ = jax.random.split(key)
    bound = 1.0 / (cout * k * k) ** 0.5
    w = jax.random.uniform(kw_, (cin, cout, k, k), jnp.float32, -bound, bound)
    b = jax.random.uniform(kb_, (cout,), jnp.float32, -bound, bound)
    return w, b


def init_generator_params(key, in_c, out_c, hidden):
    keys = jax.random.split(key, 16)
    p = {}
    p["fm1_w"], p["fm1_b"] = _init_conv(keys[0], hidden, in_c, 7)
    p["enc1_w"], p["enc1_b"] = _init_conv(keys[1], 2 * hidden, hidden, 3)
    p["enc2_w"], p["enc2_b"] = _init_conv(keys[2], 4 * hidden, 2 * hidden, 3)
    for i in range(4):
        p[f"res{i}_w1"], p[f"res{i}_b1"] = _init_conv(keys[3 + 2 * i],
                                                      4 * hidden, 4 * hidden, 3)
        p[f"res{i}_w2"], p[f"res{i}_b2"] = _init_conv(keys[4 + 2 * i],
                                                      4 * hidden, 4 * hidden, 3)
    p["dec1_w"], p["dec1_b"] = _init_convT(keys[11], 4 * hidden, 2 * hidden, 3)
    p["dec2_w"], p["dec2_b"] = _init_convT(keys[12], 2 * hidden, hidden, 3)
    p["fm2_w"], p["fm2_b"] = _init_conv(keys[13], out_c, hidden, 7)
    return p


# ---------------------------------------------------------------------------
# Generator forward (NCHW in / NCHW out)
# ---------------------------------------------------------------------------
def generator_forward(params, x_nchw, io_dtype=jnp.bfloat16,
                      max_tile=None, fuse_limit=None):
    p = params
    kw = dict(io_dtype=io_dtype, max_tile=max_tile, fuse_limit=fuse_limit)
    x = x_nchw.astype(io_dtype)
    # FeatureMapBlock (k=7, reflect pad 3, no norm / act)
    x = conv_reflect_s1(x, p["fm1_w"], p["fm1_b"], pad=3, apply_in=False,
                        activation="none", **kw)
    # EncoderBlocks (stride-2 reflect conv + InstanceNorm + ReLU)
    x = conv_encoder_s2(x, p["enc1_w"], p["enc1_b"], **kw)
    x = conv_encoder_s2(x, p["enc2_w"], p["enc2_b"], **kw)
    # ResidualBlocks
    for i in range(4):
        h = conv_reflect_s1(x, p[f"res{i}_w1"], p[f"res{i}_b1"], pad=1,
                            apply_in=True, activation="relu", **kw)
        x = conv_reflect_s1(h, p[f"res{i}_w2"], p[f"res{i}_b2"], pad=1,
                            apply_in=True, activation="none", skip=x, **kw)
    # DecoderBlocks (sub-pixel ConvTranspose + InstanceNorm + ReLU)
    x = conv_transpose_decoder(x, p["dec1_w"], p["dec1_b"], **kw)
    x = conv_transpose_decoder(x, p["dec2_w"], p["dec2_b"], **kw)
    # FeatureMapBlock (k=7) + Tanh
    x = conv_reflect_s1(x, p["fm2_w"], p["fm2_b"], pad=3, apply_in=False,
                        activation="tanh", **kw)
    return x.astype(jnp.float32)


# ---------------------------------------------------------------------------
# Pure-JAX reference (numerical check of the Pallas path)
# ---------------------------------------------------------------------------
def _ref_in(x):
    mean = jnp.mean(x, axis=(2, 3), keepdims=True)
    var = jnp.mean(jnp.square(x - mean), axis=(2, 3), keepdims=True)
    return (x - mean) * jax.lax.rsqrt(var + EPS)


def _ref_conv(x, w, b, *, stride, pad, mode):
    if pad > 0:
        x = jnp.pad(x, ((0, 0), (0, 0), (pad, pad), (pad, pad)), mode=mode)
    y = jax.lax.conv_general_dilated(x, w, (stride, stride), "VALID",
                                     dimension_numbers=("NCHW", "OIHW", "NCHW"))
    return y + b.reshape(1, -1, 1, 1)


def _ref_conv_transpose(x, w, b):
    w_dir = jnp.flip(w, (2, 3)).transpose(1, 0, 2, 3)
    y = jax.lax.conv_general_dilated(x, w_dir, (1, 1), ((1, 2), (1, 2)),
                                     lhs_dilation=(2, 2),
                                     dimension_numbers=("NCHW", "OIHW", "NCHW"))
    return y + b.reshape(1, -1, 1, 1)


def reference_forward(params, x):
    p = params
    x = _ref_conv(x, p["fm1_w"], p["fm1_b"], stride=1, pad=3, mode="reflect")
    x = jax.nn.relu(_ref_in(_ref_conv(x, p["enc1_w"], p["enc1_b"],
                                      stride=2, pad=1, mode="reflect")))
    x = jax.nn.relu(_ref_in(_ref_conv(x, p["enc2_w"], p["enc2_b"],
                                      stride=2, pad=1, mode="reflect")))
    for i in range(4):
        h = jax.nn.relu(_ref_in(_ref_conv(x, p[f"res{i}_w1"], p[f"res{i}_b1"],
                                          stride=1, pad=1, mode="reflect")))
        h = _ref_in(_ref_conv(h, p[f"res{i}_w2"], p[f"res{i}_b2"],
                              stride=1, pad=1, mode="reflect"))
        x = x + h
    x = jax.nn.relu(_ref_in(_ref_conv_transpose(x, p["dec1_w"], p["dec1_b"])))
    x = jax.nn.relu(_ref_in(_ref_conv_transpose(x, p["dec2_w"], p["dec2_b"])))
    x = _ref_conv(x, p["fm2_w"], p["fm2_b"], stride=1, pad=3, mode="reflect")
    return jnp.tanh(x)


if __name__ == "__main__":
    jax.config.update("jax_default_matmul_precision", "highest")

    _probe_buffered1()   # cache pl.Buffered(1) support before jitting the net

    key = jax.random.PRNGKey(0)
    k_param, k_input = jax.random.split(key)

    in_channels, out_channels, hidden = 3, 3, 8
    N, H, W = 2, 32, 32
    params = init_generator_params(k_param, in_channels, out_channels, hidden)
    x = jax.random.normal(k_input, (N, in_channels, H, W), jnp.float32)

    ref = jax.block_until_ready(jax.jit(reference_forward)(params, x))

    # (a) f32 I/O, forced two-pass IN + small tiles (multi-tile stats path)
    fwd_twopass = jax.jit(functools.partial(
        generator_forward, io_dtype=jnp.float32, max_tile=128, fuse_limit=0))
    out_a = jax.block_until_ready(fwd_twopass(params, x))
    assert out_a.shape == (N, out_channels, H, W), out_a.shape
    err_a = (float(jnp.max(jnp.abs(out_a - ref))),
             float(jnp.mean(jnp.abs(out_a - ref))))
    assert err_a[0] < 3e-2 and err_a[1] < 3e-3, err_a

    # (b) f32 I/O, fully fused conv+IN+act(+skip) single-call path
    fwd_fused = jax.jit(functools.partial(generator_forward,
                                          io_dtype=jnp.float32))
    out_b = jax.block_until_ready(fwd_fused(params, x))
    err_b = (float(jnp.max(jnp.abs(out_b - ref))),
             float(jnp.mean(jnp.abs(out_b - ref))))
    assert err_b[0] < 3e-2 and err_b[1] < 3e-3, err_b

    # (c) performance path: bf16 activations/weights, chip-default tiling
    fwd = jax.jit(functools.partial(generator_forward, io_dtype=jnp.bfloat16))
    out = jax.block_until_ready(fwd(params, x))
    assert out.shape == (N, out_channels, H, W), out.shape
    assert bool(jnp.all(jnp.isfinite(out)))
    assert bool(jnp.all(jnp.abs(out) <= 1.0))   # tanh output range
    print("KERNEL_OK")
</pallas_src>

<mosaic_0001>
module attributes {stable_mosaic.version = 11 : i64} {
  func.func @_k(%arg0: i32, %arg1: memref<8x128xf32, #tpu.memory_space<vmem>>, %arg2: memref<8x128xf32, #tpu.memory_space<vmem>>) attributes {dimension_semantics = [#tpu.dimension_semantics<arbitrary>], iteration_bounds = array<i64: 2>, scalar_prefetch = 0 : i64, scratch_operands = 0 : i64, tpu.core_type = #tpu.core_type<tc>, window_params = [{pipeline_mode = #tpu.pipeline_mode<synchronous>, transform_indices = @transform_0, window_bounds = array<i64: 8, 128>}, {pipeline_mode = #tpu.pipeline_mode<synchronous>, transform_indices = @transform_1, window_bounds = array<i64: 8, 128>}]} {
    %c0 = arith.constant 0 : index
    %c0_0 = arith.constant 0 : index
    %0 = vector.load %arg1[%c0, %c0_0] : memref<8x128xf32, #tpu.memory_space<vmem>>, vector<8x128xf32>
    %cst = arith.constant 1.000000e+00 : f32
    %1 = vector.broadcast %cst : f32 to vector<8x128xf32>
    %2 = arith.addf %0, %1 : vector<8x128xf32>
    %c0_1 = arith.constant 0 : index
    %c0_2 = arith.constant 0 : index
    %3 = vector.load %arg2[%c0_1, %c0_2] : memref<8x128xf32, #tpu.memory_space<vmem>>, vector<8x128xf32>
    tpu.vector_store %arg2[%c0_1, %c0_2], %2 {strides = array<i32>} : memref<8x128xf32, #tpu.memory_space<vmem>>, vector<8x128xf32>,
    return
  }
  func.func @transform_0(%arg0: i32) -> (i32, i32) {
    %c0_i32 = arith.constant 0 : i32
    %c0_i32_0 = arith.constant 0 : i32
    %c0_i32_1 = arith.constant 0 : i32
    return %c0_i32, %c0_i32_0 : i32, i32
  }
  func.func @transform_1(%arg0: i32) -> (i32, i32) {
    %c0_i32 = arith.constant 0 : i32
    %c0_i32_0 = arith.constant 0 : i32
    %c0_i32_1 = arith.constant 0 : i32
    return %c0_i32, %c0_i32_0 : i32, i32
  }
}

</mosaic_0001>

<bundles_post_ra>
// kernel: tpu_custom_call.1
= control target key start
LH: loop header
LB: loop body
LE: loop exit
PB: predicated region body
PF: predicated region fallthrough
CT: control target
= control target key end

     0   :  { %6 = vsyncpa [#allocation3], 0  ;;  %s287_s0 = inlined_call_operand.hbm [shape: f32[8,128], index: 0, kind: input, shape index: {}]   ;;  %s288_s1 = inlined_call_operand.hbm [shape: f32[8,128], index: 1, kind: output, shape index: {}]  }
   0x1   :  { %7 = vsyncpa [#allocation4], 0  ;;  %s270_s6 = smov 0  }
   0x2 LB: > { %s149_s7 = sadd.s32 4294967295, %s256_s6   ;;  %p150_p0 = scmp.ge.s32.totalorder %s256_s6, 1  ;;  %s256_s6 = sphi %s270_s6, %s13_s6  }
   0x3   : > { %p60_p1 = scmp.lt.s32.totalorder %s256_s6, 3  ;;  %s72_s10 = sshll.u32 %s287_s0, 4  ;;  %s73_s10 = int_to_ptr.hbm [resolvable:$true] %s72_s10 }
   0x4   : > { %p170_p3 = scmp.eq.s32.totalorder %s149_s7, 0  ;;  %s258_s11 = smov [#allocation2]  }
   0x5   : > { %p61_p2 = pnand %p150_p0, %p60_p1  ;;  %s74_s12 = sshll.u32 %s258_s11, 4  ;;  %s75_s12 = int_to_ptr.vmem [resolvable:$true] %s74_s12 }
   0x7   : > { %p166_p4 = pneg %p61_p2  ;;  %87 = sbr.rel (%p61_p2) target bundleno = 20 (0x14), region = 24 }
   0x9   : > { %p167_p5 = pnand %p170_p3, %p166_p4 }
   0xb   : > { %169 = dma.hbm_to_vmem [thread:$0]  (!%p167_p5), %s73_s10, 128, %s75_s12, [#allocation3]  }
   0xc   : > { %247 = dma.done.wait (%p170_p3), [#allocation3], 128  }
   0xd   : > { %249 = vsyncadd (%p170_p3), [#allocation3], 4294967168  ;;  %s259_s13 = smov [#allocation5]   ;;  %s109_s17 = sshll.u32 %s288_s1, 4  ;;  %v98_v0 = vld [vmem:[#allocation2] sm:$0xff]  ;;  %s110_s17 = int_to_ptr.hbm [resolvable:$true] %s109_s17 }
   0xe   : > { %s107_s14 = sshll.u32 %s259_s13, 4  ;;  %p172_p6 = scmp.eq.s32.totalorder %s149_s7, 1  ;;  %v99_v1 = vadd.f32 1.0, %v98_v0  ;;  %s108_s14 = int_to_ptr.vmem [resolvable:$true] %s107_s14 }
  0x10   : > { %100 = vst [vmem:[#allocation5] sm:$0xff] %v99_v1 }
  0x11   : > { %163 = dma.vmem_to_hbm [thread:$0]  (%p172_p6), %s108_s14, 128, %s110_s17, [#allocation4]  }
  0x12   : > { %251 = dma.done.wait (%p172_p6), [#allocation4], 128  }
  0x13   : > { %253 = vsyncadd (%p172_p6), [#allocation4], 4294967168 }
  0x14 PF: > { %s13_s6 = sadd.s32 1, %s256_s6  }
  0x15   : > { %p10_p7 = scmp.ge.s32.totalorder %s13_s6, 4  }
  0x17   :  { %12 = sbr.rel (!%p10_p7) target bundleno = 2 (0x2), region = 53 }
  0x1c   :  { %123 = vsyncpa [#allocation3], 1 }
  0x1d   :  { %125 = vsyncpa [#allocation3 + $0x1], 1 }
  0x1e   :  { %126 = vsyncpa [#allocation4], 1 }
  0x1f   :  { %128 = vsyncpa [#allocation4 + $0x1], 1 }

// kernel: reverse
= control target key start
LH: loop header
LB: loop body
LE: loop exit
PB: predicated region body
PF: predicated region fallthrough
CT: control target
= control target key end

     0   :  { %s224_s0 = inlined_call_operand.vmem [shape: f32[3,16,6,8], index: 0, kind: input, shape index: {}]   ;;  %s225_s1 = inlined_call_operand.vmem [shape: f32[3,16,6,8], index: 1, kind: output, shape index: {}]  }
   0x1   :  { %v72_v0 = vld [vmem:[%s224_s0 + $0x60] sm:$0xff]  ;;  %v73_v1 = vld [vmem:[%s224_s0 + $0x30] sm:$0xff]  ;;  %v76_v3 = vld [vmem:[%s224_s0 + $0x68] sm:$0xff] }
   0x2   :  { %v9_v2 = vld [vmem:[%s224_s0] sm:$0xff]  ;;  %4 = vst [vmem:[%s225_s1] sm:$0xff] %v72_v0  ;;  %v78_v4 = vld [vmem:[%s224_s0 + $0x38] sm:$0xff]  ;;  %v80_v5 = vld [vmem:[%s224_s0 + $0x8] sm:$0xff] }
   0x3   :  { %74 = vst [vmem:[%s225_s1 + $0x30] sm:$0xff] %v73_v1  ;;  %v82_v6 = vld [vmem:[%s224_s0 + $0x70] sm:$0xff]  ;;  %v84_v7 = vld [vmem:[%s224_s0 + $0x40] sm:$0xff]  ;;  %v88_v9 = vld [vmem:[%s224_s0 + $0x78] sm:$0xff] }
   0x4   :  { %75 = vst [vmem:[%s225_s1 + $0x60] sm:$0xff] %v9_v2  ;;  %v86_v8 = vld [vmem:[%s224_s0 + $0x10] sm:$0xff]  ;;  %v90_v10 = vld [vmem:[%s224_s0 + $0x48] sm:$0xff]  ;;  %v92_v11 = vld [vmem:[%s224_s0 + $0x18] sm:$0xff] }
   0x5   :  { %77 = vst [vmem:[%s225_s1 + $0x8] sm:$0xff] %v76_v3  ;;  %v94_v12 = vld [vmem:[%s224_s0 + $0x80] sm:$0xff]  ;;  %v96_v13 = vld [vmem:[%s224_s0 + $0x50] sm:$0xff]  ;;  %v100_v15 = vld [vmem:[%s224_s0 + $0x88] sm:$0xff] }
   0x6   :  { %79 = vst [vmem:[%s225_s1 + $0x38] sm:$0xff] %v78_v4  ;;  %v98_v14 = vld [vmem:[%s224_s0 + $0x20] sm:$0xff]  ;;  %v102_v16 = vld [vmem:[%s224_s0 + $0x58] sm:$0xff]  ;;  %v104_v17 = vld [vmem:[%s224_s0 + $0x28] sm:$0xff] }
   0x7   :  { %81 = vst [vmem:[%s225_s1 + $0x68] sm:$0xff] %v80_v5 }
   0x8   :  { %83 = vst [vmem:[%s225_s1 + $0x10] sm:$0xff] %v82_v6 }
   0x9   :  { %85 = vst [vmem:[%s225_s1 + $0x40] sm:$0xff] %v84_v7 }
   0xa   :  { %87 = vst [vmem:[%s225_s1 + $0x70] sm:$0xff] %v86_v8 }
   0xb   :  { %89 = vst [vmem:[%s225_s1 + $0x18] sm:$0xff] %v88_v9 }
   0xc   :  { %91 = vst [vmem:[%s225_s1 + $0x48] sm:$0xff] %v90_v10 }
   0xd   :  { %93 = vst [vmem:[%s225_s1 + $0x78] sm:$0xff] %v92_v11 }
   0xe   :  { %95 = vst [vmem:[%s225_s1 + $0x20] sm:$0xff] %v94_v12 }
   0xf   :  { %97 = vst [vmem:[%s225_s1 + $0x50] sm:$0xff] %v96_v13 }
  0x10   :  { %99 = vst [vmem:[%s225_s1 + $0x80] sm:$0xff] %v98_v14 }
  0x11   :  { %101 = vst [vmem:[%s225_s1 + $0x28] sm:$0xff] %v100_v15 }
  0x12   :  { %103 = vst [vmem:[%s225_s1 + $0x58] sm:$0xff] %v102_v16 }
  0x13   :  { %105 = vst [vmem:[%s225_s1 + $0x88] sm:$0xff] %v104_v17 }

</bundles_post_ra>
